<compile_context>
chip_gen: v7x
topology: tpu7x:2x2x1
jax: 0.10.0
libtpu: 0.0.40
codegen_flags: <defaults>
</compile_context>

<pallas_src>
import functools
import math

import jax
import jax.numpy as jnp
from jax.experimental import pallas as pl
from jax.experimental.pallas import tpu as pltpu


def _round_up(x, m):
    return (x + m - 1) // m * m


def _gconv_score_kernel(adj_ref, feat_ref, inv_in_ref, w1_ref, b1_ref, w2t_ref,
                        z_ref, score_ref, acc_ref, *, n_true, tile_dst):
    """One (metapath, dst_tile, src_tile) grid step: GraphConv accumulate + final score."""
    k = pl.program_id(2)
    last_k = pl.num_programs(2) - 1

    # Grid-index-dependent values are computed here (top level) and closed over inside the
    # pl.when bodies below; pl.program_id must NOT be called inside a cond branch.
    row = (jax.lax.broadcasted_iota(jnp.int32, (tile_dst, 1), 0)
           + pl.program_id(1) * tile_dst)
    row_valid = (row < n_true).astype(jnp.float32)          # (TILE_DST, 1) mask of real rows

    @pl.when(k == 0)
    def _init():
        acc_ref[...] = jnp.zeros_like(acc_ref)

    # (TILE_DST, TILE_SRC) @ (TILE_SRC, D_pad) on the MXU with f32 accumulation.
    # Adjacency arrives as bf16 (halves HBM traffic, exact for 0/1); features stay f32
    # so numerics match the f32 reference.
    a = adj_ref[0].astype(jnp.float32)
    f = feat_ref[0]                              # (TILE_SRC, D_pad) = rsqrt(deg_out) * h
    acc_ref[...] += jnp.dot(a, f, preferred_element_type=jnp.float32)

    @pl.when(k == last_k)
    def _finalize():
        e = acc_ref[...] * inv_in_ref[0]          # scale rows by rsqrt(in-degree) of dst
        z_ref[...] = e[None, :, :]

        # SemanticAttention per-node score: tanh(e @ W1 + b1) . w2
        # (VPU multiply + lane reduce instead of a width-1 MXU matmul)
        proj = jnp.tanh(
            jnp.dot(e, w1_ref[...], preferred_element_type=jnp.float32) + b1_ref[...])
        s = jnp.sum(proj * w2t_ref[...], axis=-1, keepdims=True)   # (TILE_DST, 1)

        # Mask padded dst rows so they do not shift the per-metapath score mean.
        s = s * row_valid

        s_sum = jnp.sum(s, axis=0, keepdims=True)                  # (1, 1)
        score_ref[...] = jnp.broadcast_to(s_sum, (1, 1, 8, 128))


def _combine_kernel(beta_ref, z_ref, out_ref, *, num_metapaths):
    """out = sum_m beta[m] * z[m] for one dst tile; beta scalars live in SMEM."""
    acc = beta_ref[0, 0] * z_ref[0]
    for m in range(1, num_metapaths):
        acc = acc + beta_ref[0, m] * z_ref[m]
    out_ref[...] = acc


def han_layer_pallas(adj, h, w1, b1, w2, *, tile_dst=256, tile_src=512):
    """adj: (M, N_src, N_dst) dense metapath adjacencies; h: (N, D); W1:(D,H) b1:(1,H) W2:(H,1)."""
    m_paths, n, _ = adj.shape
    d = h.shape[1]
    hid = w1.shape[1]

    # ---- lane-dense / tile-aligned padded sizes --------------------------------------
    d_pad = _round_up(d, 128)                     # lane-dense feature dim
    h_pad = _round_up(hid, 128)
    n_lane = _round_up(n, 128)
    tile_src = min(tile_src, n_lane)              # multiple of 128 (adjacency lane axis)
    tile_dst = min(tile_dst, n_lane)              # multiple of 8   (sublane axis)
    n_pad = _round_up(n, math.lcm(tile_dst, tile_src))
    g_dst = n_pad // tile_dst
    g_src = n_pad // tile_src

    # ---- wrapper-side prep: degrees, scaled features, transposed bf16 adjacency ------
    adj_f = adj.astype(jnp.float32)
    inv_out = jax.lax.rsqrt(jnp.maximum(adj_f.sum(axis=2), 1.0))   # (M, N) src out-degree
    inv_in = jax.lax.rsqrt(jnp.maximum(adj_f.sum(axis=1), 1.0))    # (M, N) dst in-degree

    feat = h[None, :, :].astype(jnp.float32) * inv_out[:, :, None]  # (M, N, D)
    adj_t = jnp.swapaxes(adj_f, 1, 2)                               # (M, N_dst, N_src)

    adj_p = jnp.zeros((m_paths, n_pad, n_pad), jnp.bfloat16)
    adj_p = adj_p.at[:, :n, :n].set(adj_t.astype(jnp.bfloat16))     # exact for 0/1 edges
    feat_p = jnp.zeros((m_paths, n_pad, d_pad), jnp.float32).at[:, :n, :d].set(feat)
    inv_in_p = jnp.ones((m_paths, n_pad, 1), jnp.float32).at[:, :n, 0].set(inv_in)
    w1_p = jnp.zeros((d_pad, h_pad), jnp.float32).at[:d, :hid].set(w1.astype(jnp.float32))
    b1_p = jnp.zeros((1, h_pad), jnp.float32).at[:, :hid].set(b1.astype(jnp.float32))
    w2t_p = jnp.zeros((1, h_pad), jnp.float32).at[:, :hid].set(
        w2.astype(jnp.float32)[:, 0][None, :])

    # ---- pass 1: tiled GraphConv + per-(m, dst-tile) partial attention scores --------
    kernel = functools.partial(_gconv_score_kernel, n_true=n, tile_dst=tile_dst)
    z, score_parts = pl.pallas_call(
        kernel,
        out_shape=(
            jax.ShapeDtypeStruct((m_paths, n_pad, d_pad), jnp.float32),
            jax.ShapeDtypeStruct((m_paths, g_dst, 8, 128), jnp.float32),
        ),
        grid_spec=pltpu.PrefetchScalarGridSpec(
            num_scalar_prefetch=0,
            grid=(m_paths, g_dst, g_src),
            in_specs=[
                pl.BlockSpec((1, tile_dst, tile_src), lambda m, i, k: (m, i, k)),
                pl.BlockSpec((1, tile_src, d_pad), lambda m, i, k: (m, k, 0)),
                pl.BlockSpec((1, tile_dst, 1), lambda m, i, k: (m, i, 0)),
                pl.BlockSpec((d_pad, h_pad), lambda m, i, k: (0, 0)),
                pl.BlockSpec((1, h_pad), lambda m, i, k: (0, 0)),
                pl.BlockSpec((1, h_pad), lambda m, i, k: (0, 0)),
            ],
            out_specs=[
                pl.BlockSpec((1, tile_dst, d_pad), lambda m, i, k: (m, i, 0)),
                pl.BlockSpec((1, 1, 8, 128), lambda m, i, k: (m, i, 0, 0)),
            ],
            scratch_shapes=[pltpu.VMEM((tile_dst, d_pad), jnp.float32)],
        ),
        compiler_params=pltpu.CompilerParams(
            dimension_semantics=("parallel", "parallel", "arbitrary"),
            vmem_limit_bytes=32 * 1024 * 1024,
        ),
        cost_estimate=pl.CostEstimate(
            flops=2 * m_paths * n_pad * n_pad * d_pad
                  + 2 * m_paths * n_pad * d_pad * h_pad,
            transcendentals=m_paths * n_pad * h_pad,
            bytes_accessed=m_paths * n_pad * n_pad * 2
                           + 2 * m_paths * n_pad * d_pad * 4,
        ),
    )(adj_p, feat_p, inv_in_p, w1_p, b1_p, w2t_p)

    # ---- semantic-attention softmax over metapaths (tiny, stays in XLA) --------------
    w_scores = score_parts[:, :, 0, 0].sum(axis=1) / n      # mean over the TRUE N nodes
    beta = jax.nn.softmax(w_scores)                         # (M,)

    # ---- pass 2: weighted combine out = sum_m beta_m * z_m ---------------------------
    out_p = pl.pallas_call(
        functools.partial(_combine_kernel, num_metapaths=m_paths),
        out_shape=jax.ShapeDtypeStruct((n_pad, d_pad), jnp.float32),
        grid_spec=pltpu.PrefetchScalarGridSpec(
            num_scalar_prefetch=0,
            grid=(g_dst,),
            in_specs=[
                pl.BlockSpec(memory_space=pltpu.MemorySpace.SMEM),          # beta (1, M)
                pl.BlockSpec((m_paths, tile_dst, d_pad), lambda i: (0, i, 0)),
            ],
            out_specs=pl.BlockSpec((tile_dst, d_pad), lambda i: (i, 0)),
        ),
        compiler_params=pltpu.CompilerParams(dimension_semantics=("parallel",)),
    )(beta.reshape(1, m_paths).astype(jnp.float32), z)

    return out_p[:n, :d]


def han_layer_ref(adj, h, w1, b1, w2):
    """Pure-JAX reference mirroring the PyTorch forward."""
    embeds = []
    for m in range(adj.shape[0]):
        a = adj[m]
        deg_out = jnp.maximum(a.sum(1, keepdims=True), 1.0)
        deg_in = jnp.maximum(a.sum(0, keepdims=True), 1.0)
        e = (a.T @ (h * jax.lax.rsqrt(deg_out))) * jax.lax.rsqrt(deg_in).T
        embeds.append(e)
    z = jnp.stack(embeds, axis=1)                        # (N, M, D)
    w = jnp.mean(jnp.tanh(z @ w1 + b1) @ w2, axis=0)     # (M, 1)
    beta = jax.nn.softmax(w, axis=0)                     # (M, 1)
    return jnp.sum(beta[None] * z, axis=1)               # (N, D)


if __name__ == "__main__":
    # Small, HANLayer-consistent shapes:
    #   M metapaths, N nodes, D = in_size = out_size (GraphConv has no weight),
    #   layer_num_heads = 1, semantic-attention hidden H = 128 (module default).
    # TODO(synk): dgl.metapath_reachable_graph is replaced by dense per-metapath adjacencies.
    M, N, D, H = 3, 64, 32, 128

    key = jax.random.PRNGKey(0)
    k_adj, k_h, k_w1, k_b1, k_w2 = jax.random.split(key, 5)

    adj = jax.random.bernoulli(k_adj, p=0.25, shape=(M, N, N)).astype(jnp.float32)
    h = jax.random.normal(k_h, (N, D), dtype=jnp.float32)
    w1 = jax.random.normal(k_w1, (D, H), dtype=jnp.float32) * (1.0 / jnp.sqrt(D))
    b1 = jax.random.normal(k_b1, (1, H), dtype=jnp.float32) * 0.01
    w2 = jax.random.normal(k_w2, (H, 1), dtype=jnp.float32) * (1.0 / jnp.sqrt(H))

    out = jax.jit(han_layer_pallas)(adj, h, w1, b1, w2)
    out = jax.block_until_ready(out)

    ref = han_layer_ref(adj, h, w1, b1, w2)
    assert out.shape == (N, D)
    err = jnp.max(jnp.abs(out - ref))
    assert jnp.allclose(out, ref, atol=1e-3, rtol=1e-3), f"mismatch vs JAX ref, max err {err:.3e}"

    print("KERNEL_OK")
</pallas_src>

<mosaic_0001>
module attributes {stable_mosaic.version = 11 : i64} {
  func.func @_combine_kernel(%arg0: i32, %arg1: memref<1x3xf32, #tpu.memory_space<smem>>, %arg2: memref<3x128x128xf32, #tpu.memory_space<vmem>>, %arg3: memref<128x128xf32, #tpu.memory_space<vmem>>) attributes {dimension_semantics = [#tpu.dimension_semantics<parallel>], iteration_bounds = array<i64: 1>, scalar_prefetch = 0 : i64, scratch_operands = 0 : i64, tpu.core_type = #tpu.core_type<tc>, window_params = [{transform_indices = @transform_0, window_bounds = array<i64: 1, 3>}, {transform_indices = @transform_1, window_bounds = array<i64: 3, 128, 128>}, {transform_indices = @transform_2, window_bounds = array<i64: 128, 128>}]} {
    %c0 = arith.constant 0 : index
    %c0_0 = arith.constant 0 : index
    %0 = memref.load %arg1[%c0, %c0_0] : memref<1x3xf32, #tpu.memory_space<smem>>
    %c0_1 = arith.constant 0 : index
    %c0_2 = arith.constant 0 : index
    %c0_3 = arith.constant 0 : index
    %1 = vector.load %arg2[%c0_1, %c0_2, %c0_3] : memref<3x128x128xf32, #tpu.memory_space<vmem>>, vector<1x128x128xf32>
    %2 = vector.shape_cast %1 : vector<1x128x128xf32> to vector<128x128xf32>
    %3 = vector.broadcast %0 : f32 to vector<128x128xf32>
    %4 = arith.mulf %3, %2 : vector<128x128xf32>
    %c0_4 = arith.constant 0 : index
    %c1 = arith.constant 1 : index
    %5 = memref.load %arg1[%c0_4, %c1] : memref<1x3xf32, #tpu.memory_space<smem>>
    %c1_5 = arith.constant 1 : index
    %c0_6 = arith.constant 0 : index
    %c0_7 = arith.constant 0 : index
    %6 = vector.load %arg2[%c1_5, %c0_6, %c0_7] : memref<3x128x128xf32, #tpu.memory_space<vmem>>, vector<1x128x128xf32>
    %7 = vector.shape_cast %6 : vector<1x128x128xf32> to vector<128x128xf32>
    %8 = vector.broadcast %5 : f32 to vector<128x128xf32>
    %9 = arith.mulf %8, %7 : vector<128x128xf32>
    %10 = arith.addf %4, %9 : vector<128x128xf32>
    %c0_8 = arith.constant 0 : index
    %c2 = arith.constant 2 : index
    %11 = memref.load %arg1[%c0_8, %c2] : memref<1x3xf32, #tpu.memory_space<smem>>
    %c2_9 = arith.constant 2 : index
    %c0_10 = arith.constant 0 : index
    %c0_11 = arith.constant 0 : index
    %12 = vector.load %arg2[%c2_9, %c0_10, %c0_11] : memref<3x128x128xf32, #tpu.memory_space<vmem>>, vector<1x128x128xf32>
    %13 = vector.shape_cast %12 : vector<1x128x128xf32> to vector<128x128xf32>
    %14 = vector.broadcast %11 : f32 to vector<128x128xf32>
    %15 = arith.mulf %14, %13 : vector<128x128xf32>
    %16 = arith.addf %10, %15 : vector<128x128xf32>
    %c0_12 = arith.constant 0 : index
    %c0_13 = arith.constant 0 : index
    %17 = vector.load %arg3[%c0_12, %c0_13] : memref<128x128xf32, #tpu.memory_space<vmem>>, vector<128x128xf32>
    tpu.vector_store %arg3[%c0_12, %c0_13], %16 {strides = array<i32>} : memref<128x128xf32, #tpu.memory_space<vmem>>, vector<128x128xf32>,
    return
  }
  func.func @transform_0(%arg0: i32) -> (i32, i32) {
    %c0_i32 = arith.constant 0 : i32
    %c0_i32_0 = arith.constant 0 : i32
    %c0_i32_1 = arith.constant 0 : i32
    return %c0_i32, %c0_i32_0 : i32, i32
  }
  func.func @transform_1(%arg0: i32) -> (i32, i32, i32) {
    %c0_i32 = arith.constant 0 : i32
    %c0_i32_0 = arith.constant 0 : i32
    %c0_i32_1 = arith.constant 0 : i32
    return %c0_i32, %arg0, %c0_i32_0 : i32, i32, i32
  }
  func.func @transform_2(%arg0: i32) -> (i32, i32) {
    %c0_i32 = arith.constant 0 : i32
    %c0_i32_0 = arith.constant 0 : i32
    return %arg0, %c0_i32 : i32, i32
  }
}

module attributes {stable_mosaic.version = 11 : i64} {
  func.func @_gconv_score_kernel(%arg0: i32, %arg1: i32, %arg2: i32, %arg3: memref<1x128x128xbf16, #tpu.memory_space<vmem>>, %arg4: memref<1x128x128xf32, #tpu.memory_space<vmem>>, %arg5: memref<1x128x1xf32, #tpu.memory_space<vmem>>, %arg6: memref<128x128xf32, #tpu.memory_space<vmem>>, %arg7: memref<1x128xf32, #tpu.memory_space<vmem>>, %arg8: memref<1x128xf32, #tpu.memory_space<vmem>>, %arg9: memref<1x128x128xf32, #tpu.memory_space<vmem>>, %arg10: memref<1x1x8x128xf32, #tpu.memory_space<vmem>>, %arg11: memref<128x128xf32, #tpu.memory_space<vmem>>) attributes {dimension_semantics = [#tpu.dimension_semantics<parallel>, #tpu.dimension_semantics<parallel>, #tpu.dimension_semantics<arbitrary>], iteration_bounds = array<i64: 3, 1, 1>, scalar_prefetch = 0 : i64, scratch_operands = 1 : i64, tpu.core_type = #tpu.core_type<tc>, window_params = [{transform_indices = @transform_0, window_bounds = array<i64: 1, 128, 128>}, {transform_indices = @transform_1, window_bounds = array<i64: 1, 128, 128>}, {transform_indices = @transform_2, window_bounds = array<i64: 1, 128, 1>}, {pipeline_mode = #tpu.pipeline_mode<synchronous>, transform_indices = @transform_3, window_bounds = array<i64: 128, 128>}, {pipeline_mode = #tpu.pipeline_mode<synchronous>, transform_indices = @transform_4, window_bounds = array<i64: 1, 128>}, {pipeline_mode = #tpu.pipeline_mode<synchronous>, transform_indices = @transform_5, window_bounds = array<i64: 1, 128>}, {transform_indices = @transform_6, window_bounds = array<i64: 1, 128, 128>}, {transform_indices = @transform_7, window_bounds = array<i64: 1, 1, 8, 128>}]} {
    %0 = tpu.iota {dimensions = array<i32: 0>} : vector<128x1xi32>
    %c128_i32 = arith.constant 128 : i32
    %1 = arith.muli %arg1, %c128_i32 : i32
    %2 = vector.broadcast %1 : i32 to vector<128x1xi32>
    %3 = arith.addi %0, %2 : vector<128x1xi32>
    %c64_i32 = arith.constant 64 : i32
    %4 = vector.broadcast %c64_i32 : i32 to vector<128x1xi32>
    %5 = arith.cmpi slt, %3, %4 : vector<128x1xi32>
    %6 = arith.extui %5 : vector<128x1xi1> to vector<128x1xi32>
    %7 = arith.sitofp %6 : vector<128x1xi32> to vector<128x1xf32>
    %c0_i32 = arith.constant 0 : i32
    %8 = arith.cmpi eq, %arg2, %c0_i32 : i32
    %9 = arith.extui %8 : i1 to i32
    %c0_i32_0 = arith.constant 0 : i32
    %10 = arith.cmpi ne, %9, %c0_i32_0 : i32
    scf.if %10 {
      %cst_12 = arith.constant 0.000000e+00 : f32
      %23 = vector.broadcast %cst_12 : f32 to vector<128x128xf32>
      %c0_13 = arith.constant 0 : index
      %c0_14 = arith.constant 0 : index
      %24 = vector.load %arg11[%c0_13, %c0_14] : memref<128x128xf32, #tpu.memory_space<vmem>>, vector<128x128xf32>
      tpu.vector_store %arg11[%c0_13, %c0_14], %23 {strides = array<i32>} : memref<128x128xf32, #tpu.memory_space<vmem>>, vector<128x128xf32>,
    } else {
    }
    %c0 = arith.constant 0 : index
    %c0_1 = arith.constant 0 : index
    %c0_2 = arith.constant 0 : index
    %11 = vector.load %arg3[%c0, %c0_1, %c0_2] : memref<1x128x128xbf16, #tpu.memory_space<vmem>>, vector<1x128x128xbf16>
    %12 = vector.shape_cast %11 : vector<1x128x128xbf16> to vector<128x128xbf16>
    %13 = arith.extf %12 : vector<128x128xbf16> to vector<128x128xf32>
    %c0_3 = arith.constant 0 : index
    %c0_4 = arith.constant 0 : index
    %c0_5 = arith.constant 0 : index
    %14 = vector.load %arg4[%c0_3, %c0_4, %c0_5] : memref<1x128x128xf32, #tpu.memory_space<vmem>>, vector<1x128x128xf32>
    %15 = vector.shape_cast %14 : vector<1x128x128xf32> to vector<128x128xf32>
    %c0_6 = arith.constant 0 : index
    %c0_7 = arith.constant 0 : index
    %16 = vector.load %arg11[%c0_6, %c0_7] : memref<128x128xf32, #tpu.memory_space<vmem>>, vector<128x128xf32>
    %cst = arith.constant dense<0.000000e+00> : vector<128x128xf32>
    %17 = tpu.matmul %13, %15, %cst {dimension_numbers = #tpu.dot_dimension_numbers<[1], [0], [0], [1], [0, 0, 1, 1], [], []>} : vector<128x128xf32>, vector<128x128xf32>, vector<128x128xf32> -> vector<128x128xf32>
    %18 = arith.addf %16, %17 : vector<128x128xf32>
    %c0_8 = arith.constant 0 : index
    %c0_9 = arith.constant 0 : index
    %19 = vector.load %arg11[%c0_8, %c0_9] : memref<128x128xf32, #tpu.memory_space<vmem>>, vector<128x128xf32>
    tpu.vector_store %arg11[%c0_8, %c0_9], %18 {strides = array<i32>} : memref<128x128xf32, #tpu.memory_space<vmem>>, vector<128x128xf32>,
    %c0_i32_10 = arith.constant 0 : i32
    %20 = arith.cmpi eq, %arg2, %c0_i32_10 : i32
    %21 = arith.extui %20 : i1 to i32
    %c0_i32_11 = arith.constant 0 : i32
    %22 = arith.cmpi ne, %21, %c0_i32_11 : i32
    scf.if %22 {
      %c0_12 = arith.constant 0 : index
      %c0_13 = arith.constant 0 : index
      %23 = vector.load %arg11[%c0_12, %c0_13] : memref<128x128xf32, #tpu.memory_space<vmem>>, vector<128x128xf32>
      %c0_14 = arith.constant 0 : index
      %c0_15 = arith.constant 0 : index
      %c0_16 = arith.constant 0 : index
      %24 = vector.load %arg5[%c0_14, %c0_15, %c0_16] : memref<1x128x1xf32, #tpu.memory_space<vmem>>, vector<1x128x1xf32>
      %25 = vector.shape_cast %24 : vector<1x128x1xf32> to vector<128x1xf32>
      %26 = vector.broadcast %25 : vector<128x1xf32> to vector<128x128xf32>
      %27 = arith.mulf %23, %26 : vector<128x128xf32>
      %28 = vector.shape_cast %27 : vector<128x128xf32> to vector<1x128x128xf32>
      %c0_17 = arith.constant 0 : index
      %c0_18 = arith.constant 0 : index
      %c0_19 = arith.constant 0 : index
      %29 = vector.load %arg9[%c0_17, %c0_18, %c0_19] : memref<1x128x128xf32, #tpu.memory_space<vmem>>, vector<1x128x128xf32>
      tpu.vector_store %arg9[%c0_17, %c0_18, %c0_19], %28 {strides = array<i32>} : memref<1x128x128xf32, #tpu.memory_space<vmem>>, vector<1x128x128xf32>,
      %c0_20 = arith.constant 0 : index
      %c0_21 = arith.constant 0 : index
      %30 = vector.load %arg6[%c0_20, %c0_21] : memref<128x128xf32, #tpu.memory_space<vmem>>, vector<128x128xf32>
      %cst_22 = arith.constant dense<0.000000e+00> : vector<128x128xf32>
      %31 = tpu.matmul %27, %30, %cst_22 {dimension_numbers = #tpu.dot_dimension_numbers<[1], [0], [0], [1], [0, 0, 1, 1], [], []>} : vector<128x128xf32>, vector<128x128xf32>, vector<128x128xf32> -> vector<128x128xf32>
      %c0_23 = arith.constant 0 : index
      %c0_24 = arith.constant 0 : index
      %32 = vector.load %arg7[%c0_23, %c0_24] : memref<1x128xf32, #tpu.memory_space<vmem>>, vector<1x128xf32>
      %33 = vector.broadcast %32 : vector<1x128xf32> to vector<128x128xf32>
      %34 = arith.addf %31, %33 : vector<128x128xf32>
      %35 = math.tanh %34 : vector<128x128xf32>
      %c0_25 = arith.constant 0 : index
      %c0_26 = arith.constant 0 : index
      %36 = vector.load %arg8[%c0_25, %c0_26] : memref<1x128xf32, #tpu.memory_space<vmem>>, vector<1x128xf32>
      %37 = vector.broadcast %36 : vector<1x128xf32> to vector<128x128xf32>
      %38 = arith.mulf %35, %37 : vector<128x128xf32>
      %cst_27 = arith.constant dense<0.000000e+00> : vector<128xf32>
      %39 = vector.multi_reduction <add>, %38, %cst_27 [1] : vector<128x128xf32> to vector<128xf32>
      %40 = vector.shape_cast %39 : vector<128xf32> to vector<128x1xf32>
      %41 = arith.mulf %40, %7 : vector<128x1xf32>
      %cst_28 = arith.constant dense<0.000000e+00> : vector<1xf32>
      %42 = vector.multi_reduction <add>, %41, %cst_28 [0] : vector<128x1xf32> to vector<1xf32>
      %43 = vector.shape_cast %42 : vector<1xf32> to vector<1x1xf32>
      %44 = vector.shape_cast %43 : vector<1x1xf32> to vector<1x1x1x1xf32>
      %45 = vector.broadcast %44 : vector<1x1x1x1xf32> to vector<1x1x8x128xf32>
      %c0_29 = arith.constant 0 : index
      %c0_30 = arith.constant 0 : index
      %c0_31 = arith.constant 0 : index
      %c0_32 = arith.constant 0 : index
      %46 = vector.load %arg10[%c0_29, %c0_30, %c0_31, %c0_32] : memref<1x1x8x128xf32, #tpu.memory_space<vmem>>, vector<1x1x8x128xf32>
      tpu.vector_store %arg10[%c0_29, %c0_30, %c0_31, %c0_32], %45 {strides = array<i32>} : memref<1x1x8x128xf32, #tpu.memory_space<vmem>>, vector<1x1x8x128xf32>,
    } else {
    }
    return
  }
  func.func @transform_0(%arg0: i32, %arg1: i32, %arg2: i32) -> (i32, i32, i32) {
    %c0_i32 = arith.constant 0 : i32
    return %arg0, %arg1, %arg2 : i32, i32, i32
  }
  func.func @transform_1(%arg0: i32, %arg1: i32, %arg2: i32) -> (i32, i32, i32) {
    %c0_i32 = arith.constant 0 : i32
    %c0_i32_0 = arith.constant 0 : i32
    return %arg0, %arg2, %c0_i32 : i32, i32, i32
  }
  func.func @transform_2(%arg0: i32, %arg1: i32, %arg2: i32) -> (i32, i32, i32) {
    %c0_i32 = arith.constant 0 : i32
    %c0_i32_0 = arith.constant 0 : i32
    return %arg0, %arg1, %c0_i32 : i32, i32, i32
  }
  func.func @transform_3(%arg0: i32, %arg1: i32, %arg2: i32) -> (i32, i32) {
    %c0_i32 = arith.constant 0 : i32
    %c0_i32_0 = arith.constant 0 : i32
    %c0_i32_1 = arith.constant 0 : i32
    return %c0_i32, %c0_i32_0 : i32, i32
  }
  func.func @transform_4(%arg0: i32, %arg1: i32, %arg2: i32) -> (i32, i32) {
    %c0_i32 = arith.constant 0 : i32
    %c0_i32_0 = arith.constant 0 : i32
    %c0_i32_1 = arith.constant 0 : i32
    return %c0_i32, %c0_i32_0 : i32, i32
  }
  func.func @transform_5(%arg0: i32, %arg1: i32, %arg2: i32) -> (i32, i32) {
    %c0_i32 = arith.constant 0 : i32
    %c0_i32_0 = arith.constant 0 : i32
    %c0_i32_1 = arith.constant 0 : i32
    return %c0_i32, %c0_i32_0 : i32, i32
  }
  func.func @transform_6(%arg0: i32, %arg1: i32, %arg2: i32) -> (i32, i32, i32) {
    %c0_i32 = arith.constant 0 : i32
    %c0_i32_0 = arith.constant 0 : i32
    return %arg0, %arg1, %c0_i32 : i32, i32, i32
  }
  func.func @transform_7(%arg0: i32, %arg1: i32, %arg2: i32) -> (i32, i32, i32, i32) {
    %c0_i32 = arith.constant 0 : i32
    %c0_i32_0 = arith.constant 0 : i32
    %c0_i32_1 = arith.constant 0 : i32
    return %arg0, %arg1, %c0_i32, %c0_i32_0 : i32, i32, i32, i32
  }
}

</mosaic_0001>

<bundles_post_ra>
// kernel: han_layer_pallas.3
= control target key start
LH: loop header
LB: loop body
LE: loop exit
PB: predicated region body
PF: predicated region fallthrough
CT: control target
= control target key end

     0   :  { %7 = vsyncpa [#allocation3], 0  ;;  %s495_s0 = inlined_call_operand.vmem [shape: f32[1,3], index: 0, kind: input, shape index: {}]   ;;  %s496_s1 = inlined_call_operand.vmem [shape: f32[3,128,128], index: 1, kind: input, shape index: {}]   ;;  %s497_s2 = inlined_call_operand.vmem [shape: f32[128,128], index: 2, kind: output, shape index: {}]  }
   0x1   :  { %s14_s11 = sshll.u32 %s495_s0, 4  ;;  %s15_s11 = int_to_ptr.vmem [resolvable:$true] %s14_s11 }
   0x2   :  { %s216_s12 = scalar_lea.vmem %s15_s11, 16  ;;  %p221_p1 = scmp.lt.s32.totalorder %s15_s11, %s15_s11 }
   0x3   :  { %p217_p0 = scmp.ne.s32.totalorder %s15_s11, %s216_s12  ;;  %p222_p2 = scmp.lt.s32.totalorder %s216_s12, %s216_s12 }
   0x5   :  { %p223_p3 = por %p222_p2, %p221_p1 }
   0x7   :  { %p224_p4 = pnand %p223_p3, %p217_p0 }
   0x9   :  { %227 = shalt.err (!%p224_p4)
}
   0xa   :  { %s230_s13 = smov [#allocation2]  }
   0xb   :  { %17 = dma.vmem_to_smem %s15_s11, 16, %s230_s13, [#allocation3]  }
   0xc   :  { %228 = dma.done.wait [#allocation3], 16  }
   0xd   :  { %229 = vsyncadd [#allocation3], 4294967280 }
   0xe   :  { %23 = sfence }
   0xf   :  { %s24_s14 = sld [smem:[#allocation2]]  ;;  %s181_s15 = sld [smem:[#allocation2 + $0x1]]  ;;  %v25_v0 = vld [vmem:[%s496_s1] sm:$0xff]  ;;  %v26_v3 = vld [vmem:[%s496_s1 + $0x8] sm:$0xff]  ;;  %v27_v6 = vld [vmem:[%s496_s1 + $0x10] sm:$0xff] }
  0x10   :  { %s198_s16 = sld [smem:[#allocation2 + $0x2]]  ;;  %v182_v1 = vld [vmem:[%s496_s1 + $0x80] sm:$0xff]  ;;  %v183_v4 = vld [vmem:[%s496_s1 + $0x88] sm:$0xff]  ;;  %v184_v7 = vld [vmem:[%s496_s1 + $0x90] sm:$0xff] }
  0x11   :  { %v199_v2 = vld [vmem:[%s496_s1 + $0x100] sm:$0xff]  ;;  %v200_v5 = vld [vmem:[%s496_s1 + $0x108] sm:$0xff]  ;;  %v201_v10 = vld [vmem:[%s496_s1 + $0x110] sm:$0xff] }
  0x12   :  { %v28_v11 = vld [vmem:[%s496_s1 + $0x18] sm:$0xff]  ;;  %v29_v18 = vld [vmem:[%s496_s1 + $0x20] sm:$0xff]  ;;  %v30_v29 = vld [vmem:[%s496_s1 + $0x28] sm:$0xff] }
  0x13   :  { %v185_v16 = vld [vmem:[%s496_s1 + $0x98] sm:$0xff]  ;;  %v186_v23 = vld [vmem:[%s496_s1 + $0xa0] sm:$0xff]  ;;  %v187_v30 = vld [vmem:[%s496_s1 + $0xa8] sm:$0xff] }
  0x14   :  { %v202_v17 = vld [vmem:[%s496_s1 + $0x118] sm:$0xff]  ;;  %v203_v24 = vld [vmem:[%s496_s1 + $0x120] sm:$0xff]  ;;  %v204_v35 = vld [vmem:[%s496_s1 + $0x128] sm:$0xff] }
  0x15   :  { %v273_v8 = vstv %s24_s14  ;;  %v275_v9 = vstv %s181_s15  ;;  %v31_v36 = vld [vmem:[%s496_s1 + $0x30] sm:$0xff]  ;;  %v32_v47 = vld [vmem:[%s496_s1 + $0x38] sm:$0xff] }
  0x16   :  { %v42_v12 = vmul.f32 %v273_v8, %v25_v0  ;;  %v77_v13 = vmul.f32 %v182_v1, %v275_v9  ;;  %v285_v14 = vstv %s198_s16  ;;  %v43_v15 = vmul.f32 %v273_v8, %v26_v3  ;;  %v188_v41 = vld [vmem:[%s496_s1 + $0xb0] sm:$0xff]  ;;  %v189_v48 = vld [vmem:[%s496_s1 + $0xb8] sm:$0xff]  ;;  %v33_v54 = vld [vmem:[%s496_s1 + $0x40] sm:$0xff] }
  0x17   :  { %v128_v19 = vmul.f32 %v199_v2, %v285_v14  ;;  %v78_v20 = vmul.f32 %v183_v4, %v275_v9  ;;  %v129_v21 = vmul.f32 %v200_v5, %v285_v14  ;;  %v44_v22 = vmul.f32 %v273_v8, %v27_v6  ;;  %v205_v42 = vld [vmem:[%s496_s1 + $0x130] sm:$0xff]  ;;  %v206_v49 = vld [vmem:[%s496_s1 + $0x138] sm:$0xff]  ;;  %v190_v55 = vld [vmem:[%s496_s1 + $0xc0] sm:$0xff] }
  0x18   :  { %v93_v25 = vadd.f32 %v77_v13, %v42_v12  ;;  %v79_v26 = vmul.f32 %v184_v7, %v275_v9  ;;  %v130_v27 = vmul.f32 %v201_v10, %v285_v14  ;;  %v45_v28 = vmul.f32 %v273_v8, %v28_v11  ;;  %v207_v60 = vld [vmem:[%s496_s1 + $0x140] sm:$0xff]  ;;  %v34_v61 = vld [vmem:[%s496_s1 + $0x48] sm:$0xff]  ;;  %v35_v4 = vld [vmem:[%s496_s1 + $0x50] sm:$0xff] }
  0x19   :  { %v94_v31 = vadd.f32 %v78_v20, %v43_v15  ;;  %v80_v32 = vmul.f32 %v185_v16, %v275_v9  ;;  %v131_v33 = vmul.f32 %v202_v17, %v285_v14  ;;  %v46_v34 = vmul.f32 %v273_v8, %v29_v18  ;;  %v191_v62 = vld [vmem:[%s496_s1 + $0xc8] sm:$0xff]  ;;  %v192_v11 = vld [vmem:[%s496_s1 + $0xd0] sm:$0xff]  ;;  %v36_v18 = vld [vmem:[%s496_s1 + $0x58] sm:$0xff] }
  0x1a   :  { %v144_v37 = vadd.f32 %v128_v19, %v93_v25  ;;  %v95_v38 = vadd.f32 %v79_v26, %v44_v22  ;;  %v81_v39 = vmul.f32 %v186_v23, %v275_v9  ;;  %v132_v40 = vmul.f32 %v203_v24, %v285_v14  ;;  %v208_v3 = vld [vmem:[%s496_s1 + $0x148] sm:$0xff]  ;;  %v209_v12 = vld [vmem:[%s496_s1 + $0x150] sm:$0xff]  ;;  %v193_v19 = vld [vmem:[%s496_s1 + $0xd8] sm:$0xff] }
  0x1b   :  { %v145_v43 = vadd.f32 %v129_v21, %v94_v31  ;;  %v96_v44 = vadd.f32 %v80_v32, %v45_v28  ;;  %v47_v45 = vmul.f32 %v273_v8, %v30_v29  ;;  %v82_v46 = vmul.f32 %v187_v30, %v275_v9  ;;  %v210_v20 = vld [vmem:[%s496_s1 + $0x158] sm:$0xff]  ;;  %v37_v25 = vld [vmem:[%s496_s1 + $0x60] sm:$0xff]  ;;  %v38_v32 = vld [vmem:[%s496_s1 + $0x68] sm:$0xff] }
  0x1c   :  { %160 = vst [vmem:[%s497_s2] sm:$0xff] %v144_v37  ;;  %v146_v50 = vadd.f32 %v130_v27, %v95_v38  ;;  %v97_v51 = vadd.f32 %v81_v39, %v46_v34  ;;  %v133_v52 = vmul.f32 %v204_v35, %v285_v14  ;;  %v48_v53 = vmul.f32 %v273_v8, %v31_v36  ;;  %v194_v26 = vld [vmem:[%s496_s1 + $0xe0] sm:$0xff]  ;;  %v212_v38 = vld [vmem:[%s496_s1 + $0x168] sm:$0xff]  ;;  %v39_v39 = vld [vmem:[%s496_s1 + $0x70] sm:$0xff] }
  0x1d   :  { %161 = vst [vmem:[%s497_s2 + $0x8] sm:$0xff] %v145_v43  ;;  %v147_v56 = vadd.f32 %v131_v33, %v96_v44  ;;  %v98_v57 = vadd.f32 %v82_v46, %v47_v45  ;;  %v83_v58 = vmul.f32 %v188_v41, %v275_v9  ;;  %v134_v59 = vmul.f32 %v205_v42, %v285_v14  ;;  %v211_v31 = vld [vmem:[%s496_s1 + $0x160] sm:$0xff]  ;;  %v195_v33 = vld [vmem:[%s496_s1 + $0xe8] sm:$0xff]  ;;  %v196_v44 = vld [vmem:[%s496_s1 + $0xf0] sm:$0xff] }
  0x1e   :  { %162 = vst [vmem:[%s497_s2 + $0x10] sm:$0xff] %v146_v50  ;;  %v148_v63 = vadd.f32 %v132_v40, %v97_v51  ;;  %v49_v0 = vmul.f32 %v273_v8, %v32_v47  ;;  %v84_v1 = vmul.f32 %v189_v48, %v275_v9  ;;  %v135_v2 = vmul.f32 %v206_v49, %v285_v14  ;;  %v213_v45 = vld [vmem:[%s496_s1 + $0x170] sm:$0xff]  ;;  %v40_v50 = vld [vmem:[%s496_s1 + $0x78] sm:$0xff] }
  0x1f   :  { %163 = vst [vmem:[%s497_s2 + $0x18] sm:$0xff] %v147_v56  ;;  %v149_v5 = vadd.f32 %v133_v52, %v98_v57  ;;  %v99_v6 = vadd.f32 %v83_v58, %v48_v53  ;;  %v50_v7 = vmul.f32 %v273_v8, %v33_v54  ;;  %v85_v10 = vmul.f32 %v190_v55, %v275_v9  ;;  %v197_v51 = vld [vmem:[%s496_s1 + $0xf8] sm:$0xff] }
  0x20   :  { %164 = vst [vmem:[%s497_s2 + $0x20] sm:$0xff] %v148_v63  ;;  %v100_v13 = vadd.f32 %v84_v1, %v49_v0  ;;  %v136_v15 = vmul.f32 %v207_v60, %v285_v14  ;;  %v51_v16 = vmul.f32 %v273_v8, %v34_v61  ;;  %v86_v17 = vmul.f32 %v191_v62, %v275_v9  ;;  %v214_v52 = vld [vmem:[%s496_s1 + $0x178] sm:$0xff] }
  0x21   :  { %165 = vst [vmem:[%s497_s2 + $0x28] sm:$0xff] %v149_v5  ;;  %v150_v21 = vadd.f32 %v134_v59, %v99_v6  ;;  %v101_v22 = vadd.f32 %v85_v10, %v50_v7  ;;  %v137_v23 = vmul.f32 %v208_v3, %v285_v14  ;;  %v52_v24 = vmul.f32 %v273_v8, %v35_v4 }
  0x22   :  { %v151_v27 = vadd.f32 %v135_v2, %v100_v13  ;;  %v102_v28 = vadd.f32 %v86_v17, %v51_v16  ;;  %v87_v29 = vmul.f32 %v192_v11, %v275_v9  ;;  %v138_v30 = vmul.f32 %v209_v12, %v285_v14 }
  0x23   :  { %166 = vst [vmem:[%s497_s2 + $0x30] sm:$0xff] %v150_v21  ;;  %v152_v34 = vadd.f32 %v136_v15, %v101_v22  ;;  %v53_v35 = vmul.f32 %v273_v8, %v36_v18  ;;  %v88_v36 = vmul.f32 %v193_v19, %v275_v9  ;;  %v139_v37 = vmul.f32 %v210_v20, %v285_v14 }
  0x24   :  { %167 = vst [vmem:[%s497_s2 + $0x38] sm:$0xff] %v151_v27  ;;  %v153_v40 = vadd.f32 %v137_v23, %v102_v28  ;;  %v103_v41 = vadd.f32 %v87_v29, %v52_v24  ;;  %v54_v42 = vmul.f32 %v273_v8, %v37_v25  ;;  %v89_v43 = vmul.f32 %v194_v26, %v275_v9 }
  0x25   :  { %168 = vst [vmem:[%s497_s2 + $0x40] sm:$0xff] %v152_v34  ;;  %v104_v46 = vadd.f32 %v88_v36, %v53_v35  ;;  %v140_v47 = vmul.f32 %v211_v31, %v285_v14  ;;  %v55_v48 = vmul.f32 %v273_v8, %v38_v32  ;;  %v90_v49 = vmul.f32 %v195_v33, %v275_v9 }
  0x26   :  { %169 = vst [vmem:[%s497_s2 + $0x48] sm:$0xff] %v153_v40  ;;  %v154_v53 = vadd.f32 %v138_v30, %v103_v41  ;;  %v105_v54 = vadd.f32 %v89_v43, %v54_v42  ;;  %v141_v55 = vmul.f32 %v212_v38, %v285_v14  ;;  %v56_v56 = vmul.f32 %v273_v8, %v39_v39 }
  0x27   :  { %v155_v57 = vadd.f32 %v139_v37, %v104_v46  ;;  %v106_v58 = vadd.f32 %v90_v49, %v55_v48  ;;  %v91_v59 = vmul.f32 %v196_v44, %v275_v9  ;;  %v142_v60 = vmul.f32 %v213_v45, %v285_v14 }
  0x28   :  { %170 = vst [vmem:[%s497_s2 + $0x50] sm:$0xff] %v154_v53  ;;  %v156_v61 = vadd.f32 %v140_v47, %v105_v54  ;;  %v57_v62 = vmul.f32 %v273_v8, %v40_v50  ;;  %v92_v63 = vmul.f32 %v197_v51, %v275_v9  ;;  %v143_v0 = vmul.f32 %v214_v52, %v285_v14 }
  0x29   :  { %171 = vst [vmem:[%s497_s2 + $0x58] sm:$0xff] %v155_v57  ;;  %v157_v1 = vadd.f32 %v141_v55, %v106_v58  ;;  %v107_v2 = vadd.f32 %v91_v59, %v56_v56 }
  0x2a   :  { %172 = vst [vmem:[%s497_s2 + $0x60] sm:$0xff] %v156_v61  ;;  %v108_v3 = vadd.f32 %v92_v63, %v57_v62 }
  0x2b   :  { %173 = vst [vmem:[%s497_s2 + $0x68] sm:$0xff] %v157_v1  ;;  %v158_v8 = vadd.f32 %v142_v60, %v107_v2 }
  0x2c   :  { %v159_v4 = vadd.f32 %v143_v0, %v108_v3 }
  0x2d   :  { %174 = vst [vmem:[%s497_s2 + $0x70] sm:$0xff] %v158_v8 }
  0x2e   :  { %175 = vst [vmem:[%s497_s2 + $0x78] sm:$0xff] %v159_v4 }
  0x2f   :  { %180 = vsyncpa [#allocation3], 1 }

// kernel: han_layer_pallas.2
= control target key start
LH: loop header
LB: loop body
LE: loop exit
PB: predicated region body
PF: predicated region fallthrough
CT: control target
= control target key end

     0   :  { %s1790_s24 = smov 0   ;;  %s1792_s25 = smov 0   ;;  %s2000_s0 = inlined_call_operand.vmem [shape: bf16[3,128,128], index: 0, kind: input, shape index: {}]   ;;  %s2001_s1 = inlined_call_operand.vmem [shape: f32[3,128,128], index: 1, kind: input, shape index: {}]   ;;  %s2002_s2 = inlined_call_operand.vmem [shape: f32[3,128,1], index: 2, kind: input, shape index: {}]   ;;  %s2003_s3 = inlined_call_operand.vmem [shape: f32[128,128], index: 3, kind: input, shape index: {}]   ;;  %s2004_s4 = inlined_call_operand.vmem [shape: f32[1,128], index: 4, kind: input, shape index: {}]   ;;  %s2005_s5 = inlined_call_operand.vmem [shape: f32[1,128], index: 5, kind: input, shape index: {}]   ;;  %s2006_s6 = inlined_call_operand.vmem [shape: f32[3,128,128], index: 6, kind: output, shape index: {0}]   ;;  %s2007_s7 = inlined_call_operand.vmem [shape: f32[3,1,8,128], index: 7, kind: output, shape index: {1}]  }
   0x1   :  { %s1794_s26 = smov 0  }
   0x2 LB: > { %s37_s27 = sadd.s32 1, %s1743_s25  ;;  %p1369_p0 = scmp.ge.s32.totalorder %s1747_s26, 1  ;;  %s1747_s26 = sphi %s1794_s26, %s18_s26   ;;  %s1743_s25 = sphi %s1792_s25, %s2009_s25   ;;  %s1739_s24 = sphi %s1790_s24, %s2008_s24  }
   0x3   : > { %p39_p1 = scmp.ge.s32.totalorder %s37_s27, 3  ;;  %p309_p2 = scmp.lt.s32.totalorder %s1747_s26, 4 }
   0x5   : > { %s2011_s27 = smov (%p39_p1, %s37_s27), 0  ;;  %p310_p3 = pnand %p1369_p0, %p309_p2 }
   0x6   : > { %p378_p4 = scmp.lt.s32.totalorder (!%p310_p3), %s1739_s24, 2  ;;  %v1749_v0 = vmov (!%p310_p3), 0   ;;  %v918_v24 = vld [vmem:[%s2003_s3] sm:$0xff] (!%p310_p3)  ;;  %v919_v25 = vld [vmem:[%s2003_s3 + $0x8] sm:$0xff] (!%p310_p3)  ;;  %v920_v28 = vld [vmem:[%s2003_s3 + $0x10] sm:$0xff] (!%p310_p3) }
   0x7   : > { %313 = sbr.rel (%p310_p3) target bundleno = 687 (0x2af), region = 44  ;;  %1691 = vset.pattern.permute.xlu0 (!%p310_p3), %v1749_v0  ;;  %1692 = vset.pattern.permute.xlu1 (!%p310_p3), %v1749_v0  ;;  %v1634_v27 = vpack.c.bf16 (!%p310_p3), %v919_v25, %v918_v24  ;;  %v921_v29 = vld [vmem:[%s2003_s3 + $0x18] sm:$0xff] (!%p310_p3)  ;;  %v922_v32 = vld [vmem:[%s2003_s3 + $0x20] sm:$0xff] (!%p310_p3)  ;;  %v923_v33 = vld [vmem:[%s2003_s3 + $0x28] sm:$0xff] (!%p310_p3) }
   0x8   : > { %v1638_v31 = vpack.c.bf16 (!%p310_p3), %v921_v29, %v920_v28  ;;  %v1642_v39 = vpack.c.bf16 (!%p310_p3), %v923_v33, %v922_v32  ;;  %v924_v40 = vld [vmem:[%s2003_s3 + $0x30] sm:$0xff] (!%p310_p3)  ;;  %v925_v41 = vld [vmem:[%s2003_s3 + $0x38] sm:$0xff] (!%p310_p3)  ;;  %v926_v48 = vld [vmem:[%s2003_s3 + $0x40] sm:$0xff] (!%p310_p3) }
   0x9   : > { %1635 = vmatprep.subr.bf16.mxu1 (!%p310_p3), %v1634_v27  ;;  %v1646_v47 = vpack.c.bf16 (!%p310_p3), %v925_v41, %v924_v40  ;;  %v927_v49 = vld [vmem:[%s2003_s3 + $0x48] sm:$0xff] (!%p310_p3)  ;;  %v928_v54 = vld [vmem:[%s2003_s3 + $0x50] sm:$0xff] (!%p310_p3)  ;;  %v929_v55 = vld [vmem:[%s2003_s3 + $0x58] sm:$0xff] (!%p310_p3) }
   0xa   : > { %1637 = vmatpush3.bf16.msra.mxu1 (!%p310_p3), %v1634_v27  ;;  %v1650_v53 = vpack.c.bf16 (!%p310_p3), %v927_v49, %v926_v48  ;;  %v1654_v60 = vpack.c.bf16 (!%p310_p3), %v929_v55, %v928_v54  ;;  %v930_v62 = vld [vmem:[%s2003_s3 + $0x60] sm:$0xff] (!%p310_p3)  ;;  %v931_v63 = vld [vmem:[%s2003_s3 + $0x68] sm:$0xff] (!%p310_p3) }
   0xb   : > { %1639 = vmatprep.subr.bf16.mxu1 (!%p310_p3), %v1638_v31 }
   0xe   : > { %s2013_s24 = smov (!%p378_p4, %s1739_s24), 2  ;;  %1641 = vmatpush3.bf16.msra.mxu1 %v1638_v31 }
   0xf   : > { %s1811_s28 = sshll.u32 %s2013_s24, 7  ;;  %s1383_s9 = sshll.u32 %s2013_s24, 6  ;;  %1643 = vmatprep.subr.bf16.mxu1 %v1642_v39 }
  0x10   : > { %s1817_s8 = scalar_lea.vmem %s2001_s1, %s1811_s28  ;;  %s1829_s12 = scalar_lea.vmem %s2000_s0, %s1383_s9 }
  0x11   : > { %v562_v1 = vld [vmem:[%s1817_s8] sm:$0xff]  ;;  %v563_v2 = vld [vmem:[%s1817_s8 + $0x8] sm:$0xff]  ;;  %v564_v3 = vld [vmem:[%s1817_s8 + $0x10] sm:$0xff]  ;;  %s1838_s15 = scalar_lea.vmem %s2002_s2, %s1811_s28  ;;  %s1927_s17 = scalar_lea.vmem %s2006_s6, %s1811_s28 }
  0x12   : > { %v1602_v4 = vpack.c.bf16 %v563_v2, %v562_v1  ;;  %v565_v5 = vld [vmem:[%s1817_s8 + $0x18] sm:$0xff]  ;;  %v566_v7 = vld [vmem:[%s1817_s8 + $0x20] sm:$0xff]  ;;  %v567_v8 = vld [vmem:[%s1817_s8 + $0x28] sm:$0xff]  ;;  %1645 = vmatpush3.bf16.msra.mxu1 %v1642_v39 }
  0x13   : > { %v1606_v6 = vpack.c.bf16 %v565_v5, %v564_v3  ;;  %v1610_v9 = vpack.c.bf16 %v567_v8, %v566_v7  ;;  %v1832_v10 = vld [vmem:[%s1829_s12] sm:$0xff]   ;;  %v568_v11 = vld [vmem:[%s1817_s8 + $0x30] sm:$0xff]  ;;  %v569_v12 = vld [vmem:[%s1817_s8 + $0x38] sm:$0xff]  ;;  %1647 = vmatprep.subr.bf16.mxu1 %v1646_v47 }
  0x14   : > { %1603 = vmatprep.subr.bf16.mxu0 %v1602_v4  ;;  %v1389_v13 = vunpack.c.l.bf16 %v1832_v10  ;;  %v790_v14 = vld [vmem:[%s1838_s15] sm:$0xff]  ;;  %v792_v15 = vld [vmem:[%s1838_s15 + $0x10] sm:$0xff]  ;;  %v1614_v16 = vpack.c.bf16 %v569_v12, %v568_v11  ;;  %v571_v18 = vld [vmem:[%s1817_s8 + $0x48] sm:$0xff]  ;;  %v1390_v58 = vunpack.c.h.bf16 %v1832_v10 }
  0x15   : > { %1605 = vmatpush3.bf16.msra.mxu0 %v1602_v4  ;;  %808 = vperm.xlu0 %1691, %v790_v14   ;;  %v570_v17 = vld [vmem:[%s1817_s8 + $0x40] sm:$0xff]  ;;  %v791_v19 = vld [vmem:[%s1838_s15 + $0x8] sm:$0xff]  ;;  %v793_v20 = vld [vmem:[%s1838_s15 + $0x18] sm:$0xff]  ;;  %v1658_v4 = vpack.c.bf16 %v931_v63, %v930_v62 }
  0x16   : > { %1607 = vmatprep.subr.bf16.mxu0 %v1606_v6  ;;  %1522 = vmatprep.mubr.f32.mxu0 %v1389_v13  ;;  %v572_v21 = vld [vmem:[%s1817_s8 + $0x50] sm:$0xff]  ;;  %v1618_v22 = vpack.c.bf16 %v571_v18, %v570_v17  ;;  %v573_v23 = vld [vmem:[%s1817_s8 + $0x58] sm:$0xff]  ;;  %v794_v26 = vld [vmem:[%s1838_s15 + $0x20] sm:$0xff] }
  0x17   : > { %818 = vperm.xlu1 %1692, %v792_v15   ;;  %v795_v30 = vld [vmem:[%s1838_s15 + $0x28] sm:$0xff]  ;;  %v1622_v34 = vpack.c.bf16 %v573_v23, %v572_v21  ;;  %v574_v35 = vld [vmem:[%s1817_s8 + $0x60] sm:$0xff]  ;;  %v796_v37 = vld [vmem:[%s1838_s15 + $0x30] sm:$0xff]  ;;  %1649 = vmatpush3.bf16.msra.mxu1 %v1646_v47 }
  0x18   : > { %v575_v36 = vld [vmem:[%s1817_s8 + $0x68] sm:$0xff]  ;;  %v797_v38 = vld [vmem:[%s1838_s15 + $0x38] sm:$0xff]  ;;  %v576_v43 = vld [vmem:[%s1817_s8 + $0x70] sm:$0xff]  ;;  %1651 = vmatprep.subr.bf16.mxu1 %v1650_v53 }
  0x19   : > { %1609 = vmatpush3.bf16.msra.mxu0 %v1606_v6  ;;  %813 = vperm.xlu0 %1691, %v791_v19   ;;  %v1626_v42 = vpack.c.bf16 %v575_v36, %v574_v35  ;;  %v577_v44 = vld [vmem:[%s1817_s8 + $0x78] sm:$0xff]  ;;  %v798_v45 = vld [vmem:[%s1838_s15 + $0x40] sm:$0xff]  ;;  %v799_v46 = vld [vmem:[%s1838_s15 + $0x48] sm:$0xff]  ;;  %s1378_s8 = sshll.u32 %s2013_s24, 3 }
  0x1a   : > { %1611 = vmatprep.subr.bf16.mxu0 %v1610_v9  ;;  %v1630_v50 = vpack.c.bf16 %v577_v44, %v576_v43  ;;  %v800_v51 = vld [vmem:[%s1838_s15 + $0x50] sm:$0xff]  ;;  %v801_v52 = vld [vmem:[%s1838_s15 + $0x58] sm:$0xff]  ;;  %v1419_v56 = vld [vmem:[%s1829_s12 + $0x8] sm:$0xff]   ;;  %s426_s23 = scalar_lea.vmem %s2007_s7, %s1378_s8 }
  0x1b   : > { %823 = vperm.xlu1 %1692, %v793_v20   ;;  %v802_v57 = vld [vmem:[%s1838_s15 + $0x60] sm:$0xff]  ;;  %v803_v59 = vld [vmem:[%s1838_s15 + $0x68] sm:$0xff]  ;;  %v1393_v61 = vunpack.c.l.bf16 %v1419_v56  ;;  %v1420_v0 = vld [vmem:[%s1829_s12 + $0x10] sm:$0xff]   ;;  %1653 = vmatpush3.bf16.msra.mxu1 %v1650_v53  ;;  %v1394_v2 = vunpack.c.h.bf16 %v1419_v56 }
  0x1c   : > { %v804_v1 = vld [vmem:[%s1838_s15 + $0x70] sm:$0xff]  ;;  %v805_v3 = vld [vmem:[%s1838_s15 + $0x78] sm:$0xff]  ;;  %1655 = vmatprep.subr.bf16.mxu1 %v1654_v60  ;;  %v1397_v5 = vunpack.c.l.bf16 %v1420_v0  ;;  %v1398_v7 = vunpack.c.h.bf16 %v1420_v0  ;;  %v1423_v12 = vld [vmem:[%s1829_s12 + $0x28] sm:$0xff]  }
  0x1d   : > { %1613 = vmatpush3.bf16.msra.mxu0 %v1610_v9  ;;  %828 = vperm.xlu0 %1691, %v794_v26   ;;  %v1421_v6 = vld [vmem:[%s1829_s12 + $0x18] sm:$0xff]   ;;  %v1422_v9 = vld [vmem:[%s1829_s12 + $0x20] sm:$0xff]   ;;  %v1409_v14 = vunpack.c.l.bf16 %v1423_v12  ;;  %v1424_v15 = vld [vmem:[%s1829_s12 + $0x30] sm:$0xff]  }
  0x1e   : > { %1615 = vmatprep.subr.bf16.mxu0 %v1614_v16  ;;  %v1401_v8 = vunpack.c.l.bf16 %v1421_v6  ;;  %v1402_v10 = vunpack.c.h.bf16 %v1421_v6  ;;  %v1405_v11 = vunpack.c.l.bf16 %v1422_v9  ;;  %v1406_v13 = vunpack.c.h.bf16 %v1422_v9  ;;  %v1425_v18 = vld [vmem:[%s1829_s12 + $0x38] sm:$0xff]   ;;  %v1948_v9 = vld [vmem:[%s2004_s4] ss:$0 sm:$0xff] }
  0x1f   : > { %833 = vperm.xlu1 %1692, %v795_v30   ;;  %1657 = vmatpush3.bf16.msra.mxu1 %v1654_v60  ;;  %v1413_v17 = vunpack.c.l.bf16 %v1424_v15  ;;  %v1414_v19 = vunpack.c.h.bf16 %v1424_v15  ;;  %v1417_v20 = vunpack.c.l.bf16 %v1425_v18  ;;  %v1418_v21 = vunpack.c.h.bf16 %v1425_v18  ;;  %v933_v23 = vld [vmem:[%s2003_s3 + $0x78] sm:$0xff] }
  0x20   : > { %1659 = vmatprep.subr.bf16.mxu1 %v1658_v4 }
  0x21   : > { %1617 = vmatpush3.bf16.msra.mxu0 %v1614_v16  ;;  %838 = vperm.xlu0 %1691, %v796_v37   ;;  %v1410_v16 = vunpack.c.h.bf16 %v1423_v12 }
  0x22   : > { %1619 = vmatprep.subr.bf16.mxu0 %v1618_v22 }
  0x23   : > { %843 = vperm.xlu1 %1692, %v797_v38   ;;  %1661 = vmatpush3.bf16.msra.mxu1 %v1658_v4 }
  0x25   : > { %1621 = vmatpush3.bf16.msra.mxu0 %v1618_v22  ;;  %848 = vperm.xlu0 %1691, %v798_v45   ;;  %v932_v22 = vld [vmem:[%s2003_s3 + $0x70] sm:$0xff] }
  0x26   : > { %1623 = vmatprep.subr.bf16.mxu0 %v1622_v34  ;;  %v1662_v24 = vpack.c.bf16 %v933_v23, %v932_v22  ;;  %v1959_v22 = vld [vmem:[%s2005_s5] ss:$0 sm:$0xff] }
  0x27   : > { %853 = vperm.xlu1 %1692, %v799_v46  }
  0x28   : > { %1663 = vmatprep.subr.bf16.mxu1 %v1662_v24 }
  0x29   : > { %1625 = vmatpush3.bf16.msra.mxu0 %v1622_v34  ;;  %858 = vperm.xlu0 %1691, %v800_v51  }
  0x2a   : > { %1627 = vmatprep.subr.bf16.mxu0 %v1626_v42  ;;  %1665 = vmatpush3.bf16.msra.mxu1 %v1662_v24 }
  0x2b   : > { %863 = vperm.xlu1 %1692, %v801_v52  }
  0x2d   : > { %1629 = vmatpush3.bf16.msra.mxu0 %v1626_v42  ;;  %868 = vperm.xlu0 %1691, %v802_v57  }
  0x2e   : > { %1631 = vmatprep.subr.bf16.mxu0 %v1630_v50 }
  0x2f   : > { %873 = vperm.xlu1 %1692, %v803_v59  }
  0x31   : > { %1633 = vmatpush3.bf16.msra.mxu0 %v1630_v50  ;;  %878 = vperm.xlu0 %1691, %v804_v1  }
  0x33   : > { %883 = vperm.xlu1 %1692, %v805_v3  }
  0x34   : > { %1523 = vmatmul.mubr.f32.vlgmr.msra.gmra.mrb[0].mxu0 %v1390_v58 }
  0x35   : > { %1525 = vmatprep.mubr.f32.mxu0 %v1393_v61 }
  0x38   : > { %1526 = vmatmul.mubr.f32.gmra.mrb[2].mxu0 %v1394_v2 }
  0x39   : > { %1528 = vmatprep.mubr.f32.mxu0 %v1397_v5 }
  0x3c   : > { %1529 = vmatmul.mubr.f32.gmra.mrb[4].mxu0 %v1398_v7 }
  0x3d   : > { %1531 = vmatprep.mubr.f32.mxu0 %v1401_v8 }
  0x40   : > { %1532 = vmatmul.mubr.f32.gmra.mrb[6].mxu0 %v1402_v10 }
  0x41   : > { %1534 = vmatprep.mubr.f32.mxu0 %v1405_v11 }
  0x44   : > { %1535 = vmatmul.mubr.f32.gmra.mrb[8].mxu0 %v1406_v13 }
  0x45   : > { %1537 = vmatprep.mubr.f32.mxu0 %v1409_v14 }
  0x48   : > { %1538 = vmatmul.mubr.f32.gmra.mrb[10].mxu0 %v1410_v16 }
  0x49   : > { %1540 = vmatprep.mubr.f32.mxu0 %v1413_v17 }
  0x4c   : > { %1541 = vmatmul.mubr.f32.gmra.mrb[12].mxu0 %v1414_v19 }
  0x4d   : > { %1543 = vmatprep.mubr.f32.mxu0 %v1417_v20 }
  0x50   : > { %1544 = vmatmul.mubr.f32.gmra.mrb[14].mxu0 %v1418_v21 }
  0x94   : > { %v809_v26 = vpop.permute.xlu0 %808 }
  0x96   : > { %v819_v25 = vpop.permute.xlu1 %818 }
  0x98   : > { %v814_v28 = vpop.permute.xlu0 %813 }
  0x9a   : > { %v824_v27 = vpop.permute.xlu1 %823 }
  0x9c   : > { %v829_v30 = vpop.permute.xlu0 %828 }
  0x9e   : > { %v834_v29 = vpop.permute.xlu1 %833 }
  0xa0   : > { %v839_v37 = vpop.permute.xlu0 %838 }
  0xa2   : > { %v844_v35 = vpop.permute.xlu1 %843 }
  0xa4   : > { %v849_v46 = vpop.permute.xlu0 %848 }
  0xa6   : > { %v854_v44 = vpop.permute.xlu1 %853 }
  0xa8   : > { %v859_v53 = vpop.permute.xlu0 %858 }
  0xaa   : > { %v864_v51 = vpop.permute.xlu1 %863 }
  0xac   : > { %v869_v62 = vpop.permute.xlu0 %868 }
  0xae   : > { %v874_v60 = vpop.permute.xlu1 %873 }
  0xb0   : > { %v879_v5 = vpop.permute.xlu0 %878 }
  0xb2   : > { %v884_v3 = vpop.permute.xlu1 %883 }
 0x107   : > { %v1524_v31 = vpop.f32.mrb[0].mxu0 }
 0x108   : > { %v887_v32 = vmul.f32 %v1524_v31, %v814_v28  ;;  %v660_v33 = vpop.f32.mrb[1].mxu0 }
 0x109   : > { %v886_v34 = vmul.f32 %v809_v26, %v660_v33 }
 0x10a   : > { %903 = vst [vmem:[%s1927_s17 + $0x8] sm:$0xff] %v887_v32 }
 0x10b   : > { %902 = vst [vmem:[%s1927_s17] sm:$0xff] %v886_v34  ;;  %v1527_v36 = vpop.f32.mrb[2].mxu0  ;;  %1578 = vmatprep.mubr.f32.mxu1 %v886_v34 }
 0x10c   : > { %v889_v38 = vmul.f32 %v1527_v36, %v824_v27  ;;  %v670_v39 = vpop.f32.mrb[3].mxu0  ;;  %1579 = vmatmul.mubr.f32.vlgmr.msra.gmra.mrb[0].mxu1 %v887_v32 }
 0x10d   : > { %v888_v40 = vmul.f32 %v819_v25, %v670_v39 }
 0x10e   : > { %905 = vst [vmem:[%s1927_s17 + $0x18] sm:$0xff] %v889_v38 }
 0x10f   : > { %904 = vst [vmem:[%s1927_s17 + $0x10] sm:$0xff] %v888_v40  ;;  %v1530_v41 = vpop.f32.mrb[4].mxu0  ;;  %1581 = vmatprep.mubr.f32.mxu1 %v888_v40 }
 0x110   : > { %v891_v42 = vmul.f32 %v1530_v41, %v834_v29  ;;  %v680_v43 = vpop.f32.mrb[5].mxu0  ;;  %1582 = vmatmul.mubr.f32.gmra.mrb[2].mxu1 %v889_v38 }
 0x111   : > { %v890_v45 = vmul.f32 %v829_v30, %v680_v43 }
 0x112   : > { %907 = vst [vmem:[%s1927_s17 + $0x28] sm:$0xff] %v891_v42 }
 0x113   : > { %906 = vst [vmem:[%s1927_s17 + $0x20] sm:$0xff] %v890_v45  ;;  %v1533_v47 = vpop.f32.mrb[6].mxu0  ;;  %1584 = vmatprep.mubr.f32.mxu1 %v890_v45 }
 0x114   : > { %v893_v48 = vmul.f32 %v1533_v47, %v844_v35  ;;  %v690_v49 = vpop.f32.mrb[7].mxu0  ;;  %1585 = vmatmul.mubr.f32.gmra.mrb[4].mxu1 %v891_v42 }
 0x115   : > { %v892_v50 = vmul.f32 %v839_v37, %v690_v49 }
 0x116   : > { %909 = vst [vmem:[%s1927_s17 + $0x38] sm:$0xff] %v893_v48 }
 0x117   : > { %908 = vst [vmem:[%s1927_s17 + $0x30] sm:$0xff] %v892_v50  ;;  %v1536_v52 = vpop.f32.mrb[8].mxu0  ;;  %1587 = vmatprep.mubr.f32.mxu1 %v892_v50 }
 0x118   : > { %v895_v54 = vmul.f32 %v1536_v52, %v854_v44  ;;  %v700_v55 = vpop.f32.mrb[9].mxu0  ;;  %1588 = vmatmul.mubr.f32.gmra.mrb[6].mxu1 %v893_v48 }
 0x119   : > { %v894_v56 = vmul.f32 %v849_v46, %v700_v55 }
 0x11a   : > { %911 = vst [vmem:[%s1927_s17 + $0x48] sm:$0xff] %v895_v54 }
 0x11b   : > { %910 = vst [vmem:[%s1927_s17 + $0x40] sm:$0xff] %v894_v56  ;;  %v1539_v57 = vpop.f32.mrb[10].mxu0  ;;  %1590 = vmatprep.mubr.f32.mxu1 %v894_v56 }
 0x11c   : > { %v897_v58 = vmul.f32 %v1539_v57, %v864_v51  ;;  %v710_v59 = vpop.f32.mrb[11].mxu0  ;;  %1591 = vmatmul.mubr.f32.gmra.mrb[8].mxu1 %v895_v54 }
 0x11d   : > { %v896_v61 = vmul.f32 %v859_v53, %v710_v59 }
 0x11e   : > { %913 = vst [vmem:[%s1927_s17 + $0x58] sm:$0xff] %v897_v58 }
 0x11f   : > { %912 = vst [vmem:[%s1927_s17 + $0x50] sm:$0xff] %v896_v61  ;;  %v1542_v63 = vpop.f32.mrb[12].mxu0  ;;  %1593 = vmatprep.mubr.f32.mxu1 %v896_v61 }
 0x120   : > { %v899_v0 = vmul.f32 %v1542_v63, %v874_v60  ;;  %v720_v1 = vpop.f32.mrb[13].mxu0  ;;  %1594 = vmatmul.mubr.f32.gmra.mrb[10].mxu1 %v897_v58 }
 0x121   : > { %v898_v2 = vmul.f32 %v869_v62, %v720_v1 }
 0x122   : > { %915 = vst [vmem:[%s1927_s17 + $0x68] sm:$0xff] %v899_v0 }
 0x123   : > { %914 = vst [vmem:[%s1927_s17 + $0x60] sm:$0xff] %v898_v2  ;;  %v1545_v4 = vpop.f32.mrb[14].mxu0  ;;  %1596 = vmatprep.mubr.f32.mxu1 %v898_v2 }
 0x124   : > { %v901_v6 = vmul.f32 %v1545_v4, %v884_v3  ;;  %v730_v7 = vpop.f32.mrb[15].mxu0  ;;  %1597 = vmatmul.mubr.f32.gmra.mrb[12].mxu1 %v899_v0 }
 0x125   : > { %v900_v8 = vmul.f32 %v879_v5, %v730_v7 }
 0x126   : > { %917 = vst [vmem:[%s1927_s17 + $0x78] sm:$0xff] %v901_v6 }
 0x127   : > { %916 = vst [vmem:[%s1927_s17 + $0x70] sm:$0xff] %v900_v8  ;;  %1599 = vmatprep.mubr.f32.mxu1 %v900_v8 }
 0x128   : > { %1600 = vmatmul.mubr.f32.gmra.mrb[14].mxu1 %v901_v6 }
 0x1df   : > { %v1580_v10 = vpop.f32.mrb[0].mxu1 }
 0x1e0   : > { %v1013_v11 = vadd.f32 %v1580_v10, %v1948_v9  ;;  %v1007_v12 = vpop.f32.mrb[1].mxu1 }
 0x1e1   : > { %v1008_v13 = vadd.f32 %v1948_v9, %v1007_v12 }
 0x1e2   : > { %1693 = vtanh.f32 %v1013_v11 }
 0x1e3   : > { %1695 = vtanh.f32 %v1008_v13  ;;  %v1583_v14 = vpop.f32.mrb[2].mxu1 }
 0x1e4   : > { %v1023_v15 = vadd.f32 %v1583_v14, %v1948_v9  ;;  %v1017_v16 = vpop.f32.mrb[3].mxu1 }
 0x1e5   : > { %v1018_v17 = vadd.f32 %v1948_v9, %v1017_v16 }
 0x1e6   : > { %1697 = vtanh.f32 %v1023_v15 }
 0x1e7   : > { %v1586_v18 = vpop.f32.mrb[4].mxu1  ;;  %1699 = vtanh.f32 %v1018_v17 }
 0x1e8   : > { %v1027_v19 = vpop.f32.mrb[5].mxu1  ;;  %v1033_v20 = vadd.f32 %v1586_v18, %v1948_v9 }
 0x1e9   : > { %v1028_v21 = vadd.f32 %v1948_v9, %v1027_v19 }
 0x1eb   : > { %1701 = vtanh.f32 %v1028_v21  ;;  %v1589_v23 = vpop.f32.mrb[6].mxu1 }
 0x1ec   : > { %v1694_v24 = vpop.eup %1693  ;;  %v1037_v25 = vpop.f32.mrb[7].mxu1  ;;  %1703 = vtanh.f32 %v1033_v20  ;;  %v1043_v27 = vadd.f32 %v1589_v23, %v1948_v9 }
 0x1ed   : > { %v1696_v26 = vpop.eup %1695  ;;  %v1038_v28 = vadd.f32 %v1948_v9, %v1037_v25  ;;  %v1110_v29 = vmul.f32 %v1694_v24, %v1959_v22 }
 0x1ee   : > { %v1109_v30 = vmul.f32 %v1696_v26, %v1959_v22 }
 0x1ef   : > { %1705 = vtanh.f32 %v1038_v28  ;;  %1127 = vadd.xlane.f32.xlu1 %v1110_v29  ;;  %v1592_v31 = vpop.f32.mrb[8].mxu1 }
 0x1f0   : > { %v1698_v32 = vpop.eup %1697  ;;  %1125 = vadd.xlane.f32.xlu0 %v1109_v30  ;;  %v1047_v33 = vpop.f32.mrb[9].mxu1  ;;  %1707 = vtanh.f32 %v1043_v27  ;;  %v1053_v34 = vadd.f32 %v1592_v31, %v1948_v9 }
 0x1f1   : > { %v1048_v35 = vadd.f32 %v1948_v9, %v1047_v33  ;;  %v1112_v36 = vmul.f32 %v1698_v32, %v1959_v22  ;;  %v1700_v37 = vpop.eup %1699 }
 0x1f2   : > { %v1111_v43 = vmul.f32 %v1700_v37, %v1959_v22 }
 0x1f3   : > { %1709 = vtanh.f32 %v1048_v35  ;;  %v1595_v38 = vpop.f32.mrb[10].mxu1 }
 0x1f4   : > { %1131 = vadd.xlane.f32.xlu0 %v1112_v36  ;;  %v1057_v39 = vpop.f32.mrb[11].mxu1  ;;  %1711 = vtanh.f32 %v1053_v34  ;;  %v1063_v41 = vadd.f32 %v1595_v38, %v1948_v9 }
 0x1f5   : > { %v1702_v40 = vpop.eup %1701  ;;  %v1058_v42 = vadd.f32 %v1948_v9, %v1057_v39 }
 0x1f6   : > { %v1113_v44 = vmul.f32 %v1702_v40, %v1959_v22  ;;  %v1704_v45 = vpop.eup %1703 }
 0x1f7   : > { %1713 = vtanh.f32 %v1058_v42  ;;  %v1598_v46 = vpop.f32.mrb[12].mxu1  ;;  %v1114_v51 = vmul.f32 %v1704_v45, %v1959_v22 }
 0x1f8   : > { %1129 = vadd.xlane.f32.xlu0 %v1111_v43  ;;  %1133 = vadd.xlane.f32.xlu1 %v1113_v44  ;;  %v1067_v47 = vpop.f32.mrb[13].mxu1  ;;  %1715 = vtanh.f32 %v1063_v41  ;;  %v1073_v49 = vadd.f32 %v1598_v46, %v1948_v9 }
 0x1f9   : > { %v1706_v48 = vpop.eup %1705  ;;  %v1068_v50 = vadd.f32 %v1948_v9, %v1067_v47 }
 0x1fa   : > { %v1115_v52 = vmul.f32 %v1706_v48, %v1959_v22  ;;  %v1708_v53 = vpop.eup %1707 }
 0x1fb   : > { %1717 = vtanh.f32 %v1068_v50  ;;  %v1601_v54 = vpop.f32.mrb[14].mxu1  ;;  %v1116_v59 = vmul.f32 %v1708_v53, %v1959_v22 }
 0x1fc   : > { %1135 = vadd.xlane.f32.xlu0 %v1114_v51  ;;  %1137 = vadd.xlane.f32.xlu1 %v1115_v52  ;;  %v1077_v55 = vpop.f32.mrb[15].mxu1  ;;  %1719 = vtanh.f32 %v1073_v49  ;;  %v1083_v57 = vadd.f32 %v1601_v54, %v1948_v9 }
 0x1fd   : > { %v1710_v56 = vpop.eup %1709  ;;  %v1078_v58 = vadd.f32 %v1948_v9, %v1077_v55 }
 0x1fe   : > { %v1117_v60 = vmul.f32 %v1710_v56, %v1959_v22  ;;  %v1712_v61 = vpop.eup %1711 }
 0x1ff   : > { %1721 = vtanh.f32 %v1078_v58  ;;  %v1118_v63 = vmul.f32 %v1712_v61, %v1959_v22 }
 0x200   : > { %1139 = vadd.xlane.f32.xlu0 %v1116_v59  ;;  %1141 = vadd.xlane.f32.xlu1 %v1117_v60  ;;  %1723 = vtanh.f32 %v1083_v57 }
 0x201   : > { %v1714_v62 = vpop.eup %1713 }
 0x202   : > { %v1119_v0 = vmul.f32 %v1714_v62, %v1959_v22  ;;  %v1716_v1 = vpop.eup %1715 }
 0x203   : > { %v1120_v3 = vmul.f32 %v1716_v1, %v1959_v22 }
 0x204   : > { %1143 = vadd.xlane.f32.xlu0 %v1118_v63  ;;  %1145 = vadd.xlane.f32.xlu1 %v1119_v0 }
 0x205   : > { %v1718_v2 = vpop.eup %1717 }
 0x206   : > { %v1121_v4 = vmul.f32 %v1718_v2, %v1959_v22  ;;  %v1720_v5 = vpop.eup %1719 }
 0x207   : > { %v1122_v7 = vmul.f32 %v1720_v5, %v1959_v22 }
 0x208   : > { %1147 = vadd.xlane.f32.xlu0 %v1120_v3  ;;  %1149 = vadd.xlane.f32.xlu1 %v1121_v4 }
 0x209   : > { %v1722_v6 = vpop.eup %1721 }
 0x20a   : > { %v1123_v8 = vmul.f32 %v1722_v6, %v1959_v22  ;;  %v1724_v9 = vpop.eup %1723 }
 0x20b   : > { %v1124_v10 = vmul.f32 %v1724_v9, %v1959_v22 }
 0x20c   : > { %1151 = vadd.xlane.f32.xlu0 %v1122_v7  ;;  %1153 = vadd.xlane.f32.xlu1 %v1123_v8 }
 0x210   : > { %1155 = vadd.xlane.f32.xlu0 %v1124_v10 }
 0x27c   : > { %v1128_v12 = vpop.xlane.xlu1 %1127 }
 0x27d   : > { %v1126_v11 = vpop.xlane.xlu0 %1125 }
 0x27e   : > { %v1173_v14 = vadd.f32 %v1128_v12, %v1126_v11 }
 0x281   : > { %v1132_v13 = vpop.xlane.xlu0 %1131 }
 0x285   : > { %v1130_v15 = vpop.xlane.xlu0 %1129  ;;  %v1134_v16 = vpop.xlane.xlu1 %1133 }
 0x286   : > { %v1174_v17 = vadd.f32 %v1173_v14, %v1130_v15 }
 0x288   : > { %v1175_v18 = vadd.f32 %v1174_v17, %v1132_v13 }
 0x289   : > { %v1136_v19 = vpop.xlane.xlu0 %1135  ;;  %v1138_v20 = vpop.xlane.xlu1 %1137 }
 0x28a   : > { %v1176_v21 = vadd.f32 %v1175_v18, %v1134_v16 }
 0x28c   : > { %v1177_v23 = vadd.f32 %v1176_v21, %v1136_v19 }
 0x28d   : > { %v1140_v24 = vpop.xlane.xlu0 %1139  ;;  %v1142_v25 = vpop.xlane.xlu1 %1141 }
 0x28e   : > { %v1178_v26 = vadd.f32 %v1177_v23, %v1138_v20  ;;  %v1165_v28 = vmul.f32 0.0, %v1142_v25 }
 0x290   : > { %v1179_v27 = vadd.f32 %v1178_v26, %v1140_v24 }
 0x291   : > { %v1144_v29 = vpop.xlane.xlu0 %1143  ;;  %v1146_v22 = vpop.xlane.xlu1 %1145 }
 0x292   : > { %v1180_v30 = vadd.f32 %v1179_v27, %v1165_v28  ;;  %v1166_v31 = vmul.f32 0.0, %v1144_v29  ;;  %v1167_v33 = vmul.f32 0.0, %v1146_v22 }
 0x294   : > { %v1181_v32 = vadd.f32 %v1180_v30, %v1166_v31 }
 0x295   : > { %v1148_v34 = vpop.xlane.xlu0 %1147  ;;  %v1150_v35 = vpop.xlane.xlu1 %1149 }
 0x296   : > { %v1182_v36 = vadd.f32 %v1181_v32, %v1167_v33  ;;  %v1168_v37 = vmul.f32 0.0, %v1148_v34  ;;  %v1169_v39 = vmul.f32 0.0, %v1150_v35 }
 0x298   : > { %v1183_v38 = vadd.f32 %v1182_v36, %v1168_v37 }
 0x299   : > { %v1152_v40 = vpop.xlane.xlu0 %1151  ;;  %v1154_v41 = vpop.xlane.xlu1 %1153 }
 0x29a   : > { %v1184_v42 = vadd.f32 %v1183_v38, %v1169_v39  ;;  %v1170_v43 = vmul.f32 0.0, %v1152_v40  ;;  %v1171_v45 = vmul.f32 0.0, %v1154_v41 }
 0x29c   : > { %v1185_v44 = vadd.f32 %v1184_v42, %v1170_v43 }
 0x29d   : > { %v1156_v46 = vpop.xlane.xlu0 %1155 }
 0x29e   : > { %v1186_v47 = vadd.f32 %v1185_v44, %v1171_v45  ;;  %v1172_v48 = vmul.f32 0.0, %v1156_v46 }
 0x2a0   : > { %v1187_v49 = vadd.f32 %v1186_v47, %v1172_v48 }
 0x2a2   : > { %v1188_v50 = vrot.slane %v1187_v49, 4 }
 0x2a4   : > { %v1189_v51 = vadd.f32 %v1188_v50, %v1187_v49 }
 0x2a6   : > { %v1190_v52 = vrot.slane %v1189_v51, 2 }
 0x2a8   : > { %v1191_v53 = vadd.f32 %v1190_v52, %v1189_v51 }
 0x2aa   : > { %v1192_v54 = vrot.slane %v1191_v53, 1 }
 0x2ac   : > { %v1193_v55 = vadd.f32 %v1192_v54, %v1191_v53 }
 0x2ae   : > { %1194 = vst [vmem:[%s426_s23] sm:$0xff] %v1193_v55 }
 0x2af PF: > { %s18_s26 = sadd.s32 1, %s1747_s26   ;;  %s2008_s24 = smov %s1743_s25 }
 0x2b0   : > { %p15_p5 = scmp.ge.s32.totalorder %s18_s26, 5   ;;  %s2009_s25 = smov %s2011_s27 }
 0x2b2   :  { %17 = sbr.rel (!%p15_p5) target bundleno = 2 (0x2), region = 100 }

</bundles_post_ra>
